<compile_context>
chip_gen: v6e
topology: v6e:2x2x1
jax: 0.10.0
libtpu: 0.0.40
codegen_flags: <defaults>
</compile_context>

<pallas_src>
import jax
import jax.numpy as jnp
from jax.experimental import pallas as pl
from jax.experimental.pallas import tpu as pltpu  # noqa: F401  (TPU lowering)


def _resblock_kernel(xw_ref, w1a_ref, w2t_ref, b2_ref, o_ref):
    # xw_ref : (9*Cin + 1, N*H*W)  stacked shifted windows (center tap first) + ones row
    # w1a_ref: (Ch, 9*Cin + 1)     conv3x3 weights flattened over (tap, cin), b1 last col
    # w2t_ref: (Cin, Ch)           conv1x1 weights, transposed
    # b2_ref : (Cin, 1)
    # o_ref  : (Cin, N*H*W)
    cin = o_ref.shape[0]
    xw = xw_ref[...]
    res = xw[:cin, :]                                    # center tap == unshifted input
    # conv3x3 (+ b1 folded in): one K=37 MXU pass, pixels fill the N dimension.
    h = jnp.dot(w1a_ref[...], xw, preferred_element_type=jnp.float32)
    h = jnp.maximum(h, 0.0)
    # conv1x1.
    y = jnp.dot(w2t_ref[...], h, preferred_element_type=jnp.float32)
    y = y + b2_ref[...] + res                            # bias + residual
    o_ref[...] = jnp.maximum(y, 0.0).astype(o_ref.dtype) # final ReLU, lane-dense store


_TAP_ORDER = (4, 0, 1, 2, 3, 5, 6, 7, 8)   # center tap first -> residual = rows [0:Cin]


@jax.jit
def resblock_forward(x_nchw, w1, b1, w2, b2):
    """x_nchw: (N, Cin, H, W) f32. w1: (3,3,Cin,Ch) HWIO, b1: (Ch,), w2: (Ch,Cin), b2: (Cin,)."""
    N, Cin, H, W = x_nchw.shape
    Ch = w1.shape[-1]
    P = H * W
    NP = N * P
    K = 9 * Cin + 1
    dt = x_nchw.dtype

    # Mini-im2col: 9 shifted zero-padded windows of each image, stacked on the sublane
    # axis (tap-major, cin-minor, center tap first), batch folded into the lane axis,
    # plus a ones row so b1 folds into the conv1 matmul.  Total ~(37, 512) f32 (~76 KB).
    xp = jnp.pad(x_nchw, ((0, 0), (0, 0), (1, 1), (1, 1)))              # (N,Cin,H+2,W+2)
    wins = [xp[:, :, t // 3:t // 3 + H, t % 3:t % 3 + W] for t in _TAP_ORDER]
    xw = jnp.stack(wins, axis=1).reshape(N, 9 * Cin, P)                 # (N, 36, P)
    xw = jnp.transpose(xw, (1, 0, 2)).reshape(9 * Cin, NP)              # (36, N*P)
    xw = jnp.concatenate([xw, jnp.ones((1, NP), dt)], axis=0)           # (37, N*P)

    # Weights: (3,3,Cin,Ch) -> (Ch, 36) matching the window row order, b1 appended.
    w1_flat = w1.reshape(9, Cin, Ch)[jnp.array(_TAP_ORDER)].reshape(9 * Cin, Ch)
    w1a = jnp.concatenate([w1_flat.T, b1.reshape(Ch, 1)], axis=1)       # (Ch, 37)
    w2t = w2.T                                                          # (Cin, Ch)
    b2c = b2.reshape(Cin, 1)

    out_cm = pl.pallas_call(
        _resblock_kernel,
        out_shape=jax.ShapeDtypeStruct((Cin, NP), dt),
        grid=(1,),                                      # single step: whole batch at once
        in_specs=[
            pl.BlockSpec((K, NP), lambda i: (0, 0)),    # stacked windows (+ones row)
            pl.BlockSpec((Ch, K), lambda i: (0, 0)),    # conv3x3 weights (+b1 column)
            pl.BlockSpec((Cin, Ch), lambda i: (0, 0)),  # conv1x1 weights^T
            pl.BlockSpec((Cin, 1), lambda i: (0, 0)),   # b2
        ],
        out_specs=pl.BlockSpec((Cin, NP), lambda i: (0, 0)),
    )(xw, w1a, w2t, b2c)

    # (Cin, N*P) -> NCHW: tiny (8 KB) layout transpose; the lane-dense in-kernel store
    # is the lever that matters, this is just plumbing.
    return jnp.transpose(out_cm.reshape(Cin, N, H, W), (1, 0, 2, 3))


def _reference_forward(x_nchw, w1, b1, w2, b2):
    """Pure-JAX reference (NHWC convs) for correctness checking."""
    x = jnp.transpose(x_nchw, (0, 2, 3, 1))
    h = jax.lax.conv_general_dilated(
        x, w1, window_strides=(1, 1), padding="SAME",
        dimension_numbers=("NHWC", "HWIO", "NHWC"))
    h = jax.nn.relu(h + b1)
    y = jax.lax.conv_general_dilated(
        h, w2.reshape(1, 1, *w2.shape), window_strides=(1, 1), padding="SAME",
        dimension_numbers=("NHWC", "HWIO", "NHWC"))
    y = jax.nn.relu(y + b2 + x)
    return jnp.transpose(y, (0, 3, 1, 2))


if __name__ == "__main__":
    # Module config: ResBlock(input_channels=4, channel=32); input NCHW (2, 4, 16, 16).
    N, Cin, H, W, Ch = 2, 4, 16, 16, 32

    key = jax.random.PRNGKey(0)
    kx, kw1, kb1, kw2, kb2 = jax.random.split(key, 5)

    x = jax.random.normal(kx, (N, Cin, H, W), dtype=jnp.float32)
    w1 = jax.random.normal(kw1, (3, 3, Cin, Ch), dtype=jnp.float32) * 0.1
    b1 = jax.random.normal(kb1, (Ch,), dtype=jnp.float32) * 0.1
    w2 = jax.random.normal(kw2, (Ch, Cin), dtype=jnp.float32) * 0.1
    b2 = jax.random.normal(kb2, (Cin,), dtype=jnp.float32) * 0.1

    out = resblock_forward(x, w1, b1, w2, b2)
    out = jax.block_until_ready(out)

    ref = jax.block_until_ready(_reference_forward(x, w1, b1, w2, b2))
    assert out.shape == (N, Cin, H, W)
    assert jnp.allclose(out, ref, atol=1e-4, rtol=1e-4), "mismatch vs reference"

    print("KERNEL_OK")
</pallas_src>

<mosaic_0001>
module attributes {stable_mosaic.version = 11 : i64} {
  func.func @_resblock_kernel(%arg0: i32, %arg1: memref<37x512xf32, #tpu.memory_space<vmem>>, %arg2: memref<32x37xf32, #tpu.memory_space<vmem>>, %arg3: memref<4x32xf32, #tpu.memory_space<vmem>>, %arg4: memref<4x1xf32, #tpu.memory_space<vmem>>, %arg5: memref<4x512xf32, #tpu.memory_space<vmem>>) attributes {dimension_semantics = [#tpu.dimension_semantics<arbitrary>], iteration_bounds = array<i64: 1>, scalar_prefetch = 0 : i64, scratch_operands = 0 : i64, tpu.core_type = #tpu.core_type<tc>, window_params = [{pipeline_mode = #tpu.pipeline_mode<synchronous>, transform_indices = @transform_0, window_bounds = array<i64: 37, 512>}, {pipeline_mode = #tpu.pipeline_mode<synchronous>, transform_indices = @transform_1, window_bounds = array<i64: 32, 37>}, {pipeline_mode = #tpu.pipeline_mode<synchronous>, transform_indices = @transform_2, window_bounds = array<i64: 4, 32>}, {pipeline_mode = #tpu.pipeline_mode<synchronous>, transform_indices = @transform_3, window_bounds = array<i64: 4, 1>}, {pipeline_mode = #tpu.pipeline_mode<synchronous>, transform_indices = @transform_4, window_bounds = array<i64: 4, 512>}]} {
    %c0 = arith.constant 0 : index
    %c0_0 = arith.constant 0 : index
    %0 = vector.load %arg1[%c0, %c0_0] : memref<37x512xf32, #tpu.memory_space<vmem>>, vector<37x512xf32>
    %1 = vector.extract_strided_slice %0 {offsets = [0, 0], sizes = [4, 512], strides = [1, 1]} : vector<37x512xf32> to vector<4x512xf32>
    %c0_1 = arith.constant 0 : index
    %c0_2 = arith.constant 0 : index
    %2 = vector.load %arg2[%c0_1, %c0_2] : memref<32x37xf32, #tpu.memory_space<vmem>>, vector<32x37xf32>
    %cst = arith.constant dense<0.000000e+00> : vector<32x512xf32>
    %3 = tpu.matmul %2, %0, %cst {dimension_numbers = #tpu.dot_dimension_numbers<[1], [0], [0], [1], [0, 0, 1, 1], [], []>} : vector<32x37xf32>, vector<37x512xf32>, vector<32x512xf32> -> vector<32x512xf32>
    %cst_3 = arith.constant 0.000000e+00 : f32
    %4 = vector.broadcast %cst_3 : f32 to vector<32x512xf32>
    %5 = arith.maximumf %3, %4 : vector<32x512xf32>
    %c0_4 = arith.constant 0 : index
    %c0_5 = arith.constant 0 : index
    %6 = vector.load %arg3[%c0_4, %c0_5] : memref<4x32xf32, #tpu.memory_space<vmem>>, vector<4x32xf32>
    %cst_6 = arith.constant dense<0.000000e+00> : vector<4x512xf32>
    %7 = tpu.matmul %6, %5, %cst_6 {dimension_numbers = #tpu.dot_dimension_numbers<[1], [0], [0], [1], [0, 0, 1, 1], [], []>} : vector<4x32xf32>, vector<32x512xf32>, vector<4x512xf32> -> vector<4x512xf32>
    %c0_7 = arith.constant 0 : index
    %c0_8 = arith.constant 0 : index
    %8 = vector.load %arg4[%c0_7, %c0_8] : memref<4x1xf32, #tpu.memory_space<vmem>>, vector<4x1xf32>
    %9 = vector.broadcast %8 : vector<4x1xf32> to vector<4x512xf32>
    %10 = arith.addf %7, %9 : vector<4x512xf32>
    %11 = arith.addf %10, %1 : vector<4x512xf32>
    %cst_9 = arith.constant 0.000000e+00 : f32
    %12 = vector.broadcast %cst_9 : f32 to vector<4x512xf32>
    %13 = arith.maximumf %11, %12 : vector<4x512xf32>
    %c0_10 = arith.constant 0 : index
    %c0_11 = arith.constant 0 : index
    %14 = vector.load %arg5[%c0_10, %c0_11] : memref<4x512xf32, #tpu.memory_space<vmem>>, vector<4x512xf32>
    tpu.vector_store %arg5[%c0_10, %c0_11], %13 {strides = array<i32>} : memref<4x512xf32, #tpu.memory_space<vmem>>, vector<4x512xf32>,
    return
  }
  func.func @transform_0(%arg0: i32) -> (i32, i32) {
    %c0_i32 = arith.constant 0 : i32
    %c0_i32_0 = arith.constant 0 : i32
    %c0_i32_1 = arith.constant 0 : i32
    return %c0_i32, %c0_i32_0 : i32, i32
  }
  func.func @transform_1(%arg0: i32) -> (i32, i32) {
    %c0_i32 = arith.constant 0 : i32
    %c0_i32_0 = arith.constant 0 : i32
    %c0_i32_1 = arith.constant 0 : i32
    return %c0_i32, %c0_i32_0 : i32, i32
  }
  func.func @transform_2(%arg0: i32) -> (i32, i32) {
    %c0_i32 = arith.constant 0 : i32
    %c0_i32_0 = arith.constant 0 : i32
    %c0_i32_1 = arith.constant 0 : i32
    return %c0_i32, %c0_i32_0 : i32, i32
  }
  func.func @transform_3(%arg0: i32) -> (i32, i32) {
    %c0_i32 = arith.constant 0 : i32
    %c0_i32_0 = arith.constant 0 : i32
    %c0_i32_1 = arith.constant 0 : i32
    return %c0_i32, %c0_i32_0 : i32, i32
  }
  func.func @transform_4(%arg0: i32) -> (i32, i32) {
    %c0_i32 = arith.constant 0 : i32
    %c0_i32_0 = arith.constant 0 : i32
    %c0_i32_1 = arith.constant 0 : i32
    return %c0_i32, %c0_i32_0 : i32, i32
  }
}

</mosaic_0001>

<bundles_post_ra>
// kernel: resblock_forward.1
= control target key start
LH: loop header
LB: loop body
LE: loop exit
PB: predicated region body
PF: predicated region fallthrough
CT: control target
= control target key end

     0   :  { %vm54_vm0 = vcmask 1044480   ;;  %v453_v3 = vmov 0.0   ;;  %vm41_vm1 = vcmask 302080   ;;  %v454_v25 = vmov 0   ;;  %s588_s0 = inlined_call_operand.vmem [shape: f32[37,512], index: 0, kind: input, shape index: {}]   ;;  %s589_s1 = inlined_call_operand.vmem [shape: f32[32,37], index: 1, kind: input, shape index: {}]   ;;  %s590_s3 = inlined_call_operand.vmem [shape: f32[4,1], index: 3, kind: input, shape index: {}]   ;;  %s591_s2 = inlined_call_operand.vmem [shape: f32[4,32], index: 2, kind: input, shape index: {}]   ;;  %s592_s4 = inlined_call_operand.vmem [shape: f32[4,512], index: 4, kind: output, shape index: {}]  }
   0x1   :  { %v34_v0 = vld [vmem:[%s588_s0 + $0x88] sm:$0x1f]  ;;  %v36_v1 = vld [vmem:[%s588_s0 + $0x98] sm:$0x1f]  ;;  %v33_v2 = vld [vmem:[%s588_s0 + $0x80] sm:$0x1f]  ;;  %131 = vmatprep.mubr.f32.mxu0 %v453_v3  ;;  %220 = vmatprep.mubr.f32.mxu1 %v453_v3 }
   0x2   :  { %436 = vmatprep.subr.msk.mxu0 %vm54_vm0, %v34_v0  ;;  %442 = vmatprep.subr.msk.mxu1 %vm54_vm0, %v36_v1  ;;  %v35_v4 = vld [vmem:[%s588_s0 + $0x90] sm:$0x1f]  ;;  %v30_v5 = vld [vmem:[%s588_s0 + $0x68] sm:$0xff]  ;;  %v32_v6 = vld [vmem:[%s588_s0 + $0x78] sm:$0xff]  ;;  %vm268_vm2 = vcmask 261120  }
   0x3   :  { %437 = vmatpush1.msk.msra.mxu0 %vm54_vm0, %v33_v2  ;;  %443 = vmatpush1.msk.msra.mxu1 %vm54_vm0, %v35_v4  ;;  %v29_v7 = vld [vmem:[%s588_s0 + $0x60] sm:$0xff]  ;;  %v31_v8 = vld [vmem:[%s588_s0 + $0x70] sm:$0xff]  ;;  %v26_v9 = vld [vmem:[%s588_s0 + $0x48] sm:$0xff] }
   0x4   :  { %91 = vmatprep.subr.mxu0 %v30_v5  ;;  %180 = vmatprep.subr.mxu1 %v32_v6  ;;  %v28_v10 = vld [vmem:[%s588_s0 + $0x58] sm:$0xff]  ;;  %v25_v11 = vld [vmem:[%s588_s0 + $0x40] sm:$0xff]  ;;  %v27_v12 = vld [vmem:[%s588_s0 + $0x50] sm:$0xff] }
   0x5   :  { %92 = vmatpush1.msra.mxu0 %v29_v7  ;;  %181 = vmatpush1.msra.mxu1 %v31_v8  ;;  %v22_v13 = vld [vmem:[%s588_s0 + $0x28] sm:$0xff]  ;;  %v24_v14 = vld [vmem:[%s588_s0 + $0x38] sm:$0xff]  ;;  %v21_v15 = vld [vmem:[%s588_s0 + $0x20] sm:$0xff] }
   0x6   :  { %93 = vmatprep.subr.mxu0 %v26_v9  ;;  %182 = vmatprep.subr.mxu1 %v28_v10  ;;  %v23_v16 = vld [vmem:[%s588_s0 + $0x30] sm:$0xff]  ;;  %v531_v17 = vld [vmem:[%s588_s0 + $0x8] sm:$0xff]  ;;  %v536_v18 = vld [vmem:[%s588_s0 + $0x18] sm:$0xff] }
   0x7   :  { %94 = vmatpush1.msra.mxu0 %v25_v11  ;;  %183 = vmatpush1.msra.mxu1 %v27_v12  ;;  %v541_v19 = vld [vmem:[%s588_s0] sm:$0xff]  ;;  %v546_v20 = vld [vmem:[%s588_s0 + $0x10] sm:$0xff]  ;;  %v38_v22 = vld [vmem:[%s589_s1 + $0x8] sm:$0xff] }
   0x8   :  { %95 = vmatprep.subr.mxu0 %v22_v13  ;;  %184 = vmatprep.subr.mxu1 %v24_v14  ;;  %v37_v21 = vld [vmem:[%s589_s1] sm:$0xff]  ;;  %v39_v23 = vld [vmem:[%s589_s1 + $0x10] sm:$0xff]  ;;  %v40_v24 = vld [vmem:[%s589_s1 + $0x18] sm:$0xff] }
   0x9   :  { %96 = vmatpush1.msra.mxu0 %v21_v15  ;;  %185 = vmatpush1.msra.mxu1 %v23_v16  ;;  %v262_v26 = vld [vmem:[%s590_s3] sm:$0xf] }
   0xa   :  { %97 = vmatprep.subr.mxu0 %v531_v17  ;;  %186 = vmatprep.subr.mxu1 %v536_v18  ;;  %v261_v59 = vld [vmem:[%s591_s2] sm:$0xf] }
   0xb   :  { %98 = vmatpush1.msra.mxu0 %v541_v19  ;;  %187 = vmatpush1.msra.mxu1 %v546_v20 }
   0xc   :  { %438 = vmatmul.mubr.msk.f32.vlgmr.msra.gmra.mxu0 %vm41_vm1, %v37_v21  ;;  %444 = vmatmul.mubr.msk.f32.vlgmr.msra.gmra.mxu1 %vm41_vm1, %v37_v21 }
   0xd   :  { %137 = vmatprep.mubr.f32.mxu0 %v453_v3  ;;  %226 = vmatprep.mubr.f32.mxu1 %v453_v3 }
   0xe   :  { %452 = vset.pattern.permute.xlu0 %v454_v25 }
   0xf   :  { %265 = vperm.xlu0 %452, %v262_v26  }
  0x10   :  { %439 = vmatmul.mubr.msk.f32.gmra.mxu0 %vm41_vm1, %v38_v22  ;;  %445 = vmatmul.mubr.msk.f32.gmra.mxu1 %vm41_vm1, %v38_v22 }
  0x11   :  { %143 = vmatprep.mubr.f32.mxu0 %v453_v3  ;;  %232 = vmatprep.mubr.f32.mxu1 %v453_v3 }
  0x14   :  { %440 = vmatmul.mubr.msk.f32.gmra.mxu0 %vm41_vm1, %v39_v23  ;;  %446 = vmatmul.mubr.msk.f32.gmra.mxu1 %vm41_vm1, %v39_v23 }
  0x15   :  { %149 = vmatprep.mubr.f32.mxu0 %v453_v3  ;;  %238 = vmatprep.mubr.f32.mxu1 %v453_v3 }
  0x18   :  { %441 = vmatmul.mubr.msk.f32.gmra.mxu0 %vm41_vm1, %v40_v24  ;;  %447 = vmatmul.mubr.msk.f32.gmra.mxu1 %vm41_vm1, %v40_v24 }
  0x19   :  { %336 = vmatprep.mubr.f32.mxu0 %v453_v3  ;;  %407 = vmatprep.mubr.f32.mxu1 %v453_v3 }
  0x8a   :  { %v266_v60 = vpop.permute.xlu0 %265 }
  0xcc   :  { %v133_v27 = vpop.f32.mrf.mxu0  ;;  %v222_v28 = vpop.f32.mrf.mxu1 }
  0xcd   :  { %v245_v57 = vmax.f32 %v133_v27, 0.0  ;;  %v247_v58 = vmax.f32 %v222_v28, 0.0 }
  0xce   :  { %v135_v29 = vpop.f32.mrf.mxu0  ;;  %v224_v30 = vpop.f32.mrf.mxu1 }
  0xcf   :  { %v246_v55 = vmax.f32 %v135_v29, 0.0  ;;  %v248_v56 = vmax.f32 %v224_v30, 0.0 }
  0xd0   :  { %v139_v31 = vpop.f32.mrf.mxu0  ;;  %v228_v32 = vpop.f32.mrf.mxu1 }
  0xd1   :  { %v249_v53 = vmax.f32 %v139_v31, 0.0  ;;  %v251_v54 = vmax.f32 %v228_v32, 0.0 }
  0xd2   :  { %v141_v33 = vpop.f32.mrf.mxu0  ;;  %v230_v34 = vpop.f32.mrf.mxu1 }
  0xd3   :  { %v250_v51 = vmax.f32 %v141_v33, 0.0  ;;  %v252_v52 = vmax.f32 %v230_v34, 0.0 }
  0xd4   :  { %v145_v35 = vpop.f32.mrf.mxu0  ;;  %v234_v36 = vpop.f32.mrf.mxu1 }
  0xd5   :  { %v253_v49 = vmax.f32 %v145_v35, 0.0  ;;  %v255_v50 = vmax.f32 %v234_v36, 0.0 }
  0xd6   :  { %v147_v37 = vpop.f32.mrf.mxu0  ;;  %v236_v38 = vpop.f32.mrf.mxu1 }
  0xd7   :  { %v254_v47 = vmax.f32 %v147_v37, 0.0  ;;  %v256_v48 = vmax.f32 %v236_v38, 0.0 }
  0xd8   :  { %v151_v39 = vpop.f32.mrf.mxu0  ;;  %v240_v40 = vpop.f32.mrf.mxu1 }
  0xd9   :  { %v257_v45 = vmax.f32 %v151_v39, 0.0  ;;  %v259_v46 = vmax.f32 %v240_v40, 0.0 }
  0xda   :  { %v153_v41 = vpop.f32.mrf.mxu0  ;;  %v242_v42 = vpop.f32.mrf.mxu1 }
  0xdb   :  { %v258_v43 = vmax.f32 %v153_v41, 0.0  ;;  %v260_v44 = vmax.f32 %v242_v42, 0.0 }
  0xdd   :  { %296 = vmatprep.subr.mxu0 %v258_v43  ;;  %367 = vmatprep.subr.mxu1 %v260_v44 }
  0xde   :  { %297 = vmatpush1.msra.mxu0 %v257_v45  ;;  %368 = vmatpush1.msra.mxu1 %v259_v46 }
  0xdf   :  { %298 = vmatprep.subr.mxu0 %v254_v47  ;;  %369 = vmatprep.subr.mxu1 %v256_v48 }
  0xe0   :  { %299 = vmatpush1.msra.mxu0 %v253_v49  ;;  %370 = vmatpush1.msra.mxu1 %v255_v50 }
  0xe1   :  { %300 = vmatprep.subr.mxu0 %v250_v51  ;;  %371 = vmatprep.subr.mxu1 %v252_v52 }
  0xe2   :  { %301 = vmatpush1.msra.mxu0 %v249_v53  ;;  %372 = vmatpush1.msra.mxu1 %v251_v54 }
  0xe3   :  { %302 = vmatprep.subr.mxu0 %v246_v55  ;;  %373 = vmatprep.subr.mxu1 %v248_v56 }
  0xe4   :  { %303 = vmatpush1.msra.mxu0 %v245_v57  ;;  %374 = vmatpush1.msra.mxu1 %v247_v58 }
  0xe5   :  { %448 = vmatmul.mubr.msk.f32.vlgmr.msra.gmra.mxu0 %vm268_vm2, %v261_v59  ;;  %449 = vmatmul.mubr.msk.f32.vlgmr.msra.gmra.mxu1 %vm268_vm2, %v261_v59 }
 0x1a5   :  { %v338_v61 = vpop.f32.mrf.mxu0  ;;  %v409_v62 = vpop.f32.mrf.mxu1 }
 0x1a6   :  { %v339_v63 = vadd.f32 %v338_v61, %v266_v60  ;;  %v410_v0 = vadd.f32 %v409_v62, %v266_v60 }
 0x1a7   :  { %v340_v1 = vpop.f32.mrf.mxu0  ;;  %v411_v2 = vpop.f32.mrf.mxu1 }
 0x1a8   :  { %v414_v3 = vadd.f32 %v339_v63, %v541_v19  ;;  %v416_v4 = vadd.f32 %v410_v0, %v546_v20  ;;  %v341_v5 = vadd.f32 %v340_v1, %v266_v60  ;;  %v412_v6 = vadd.f32 %v411_v2, %v266_v60 }
 0x1aa   :  { %v415_v7 = vadd.f32 %v341_v5, %v531_v17  ;;  %v417_v8 = vadd.f32 %v412_v6, %v536_v18  ;;  %v418_v9 = vmax.f32 %v414_v3, 0.0  ;;  %v420_v10 = vmax.f32 %v416_v4, 0.0 }
 0x1ac   :  { %v419_v11 = vmax.f32 %v415_v7, 0.0  ;;  %v421_v12 = vmax.f32 %v417_v8, 0.0 }
 0x1ae   :  { %v426_v13 = vcombine.low %v418_v9, %v419_v11  ;;  %v427_v14 = vcombine.low %v420_v10, %v421_v12 }
 0x1b0   :  { %430 = vst [vmem:[%s592_s4] sm:$0xff] %v426_v13  ;;  %431 = vst [vmem:[%s592_s4 + $0x8] sm:$0xff] %v427_v14 }

</bundles_post_ra>
